<compile_context>
chip_gen: v7x
topology: tpu7x:2x2x1
jax: 0.10.0
libtpu: 0.0.40
codegen_flags: <defaults>
</compile_context>

<pallas_src>
import jax
import jax.numpy as jnp
from jax.experimental import pallas as pl
from jax.experimental.pallas import tpu as pltpu


def _make_kernel(obs_dim, z_dim):
    def kernel(io_ref,
               w1_ref, b1_ref, w2_ref, b2_ref, w3_ref, b3_ref,
               wd1_ref, bd1_ref, wd2_ref, bd2_ref, wd3_ref, bd3_ref,
               out_ref):
        bf16 = jnp.bfloat16
        f32 = jnp.float32

        packed_in = io_ref[...]                      # [TB, obs_dim + z_dim] f32
        x = packed_in[:, :obs_dim].astype(bf16)      # static lane slice
        eps = packed_in[:, obs_dim:]                 # f32

        # ---- encoder MLP (bf16 MXU operands, f32 accumulation, VPU relu) ----
        h = jnp.dot(x, w1_ref[...], preferred_element_type=f32) + b1_ref[...]
        h = jnp.maximum(h, 0.0)
        h = jnp.dot(h.astype(bf16), w2_ref[...],
                    preferred_element_type=f32) + b2_ref[...]
        h = jnp.maximum(h, 0.0)

        # ---- fused encoder head: one matmul, static lane slices ----
        enc = jnp.dot(h.astype(bf16), w3_ref[...],
                      preferred_element_type=f32) + b3_ref[...]
        mu = enc[:, :z_dim]
        logstd = enc[:, z_dim:]
        std = jnp.exp(logstd)                        # f32 (EUP)

        # ---- reparameterized sample z = mu + std * eps (f32) ----
        z = mu + std * eps

        # ---- decoder MLP ----
        d = jnp.dot(z.astype(bf16), wd1_ref[...],
                    preferred_element_type=f32) + bd1_ref[...]
        d = jnp.maximum(d, 0.0)
        d = jnp.dot(d.astype(bf16), wd2_ref[...],
                    preferred_element_type=f32) + bd2_ref[...]
        d = jnp.maximum(d, 0.0)
        recon = jnp.dot(d.astype(bf16), wd3_ref[...],
                        preferred_element_type=f32) + bd3_ref[...]

        # ---- direct static-slice stores into the packed output slab ----
        out_ref[:, :z_dim] = mu
        out_ref[:, z_dim:2 * z_dim] = std
        out_ref[:, 2 * z_dim:] = recon

    return kernel


def _round_tile(t):
    """Round a batch tile down to a multiple of 16 (floor of 8)."""
    if t >= 16:
        return (t // 16) * 16
    return 8


def base_latent_model_forward(o, eps, params, *, z_dim, batch_tile=2048):
    """o: [B, obs_dim] f32, eps: [B, z_dim] f32, params: dict of f32 weights/biases."""
    B, obs_dim = o.shape
    hidden = params["w1"].shape[1]
    in_w = obs_dim + z_dim
    out_w = 2 * z_dim + obs_dim

    # ---- batch tiling: pad to sublane multiple, round tile, prefer >=2 tiles ----
    B_pad = max(8, pl.cdiv(B, 8) * 8)
    TB = _round_tile(min(batch_tile, B_pad))
    B_pad = pl.cdiv(B_pad, TB) * TB
    n_tiles = B_pad // TB
    if n_tiles == 1 and TB >= 16:
        # Split into two tiles so both v7x TensorCores get work.
        TB //= 2                      # TB was a multiple of 16 -> still mult. of 8
        n_tiles = 2

    # ---- one packed input slab [o | eps], batch-padded ----
    io = jnp.concatenate([o, eps], axis=-1)
    if B_pad != B:
        io = jnp.pad(io, ((0, B_pad - B), (0, 0)))

    # ---- pre-cast weights to bf16 (halves weight HBM/VMEM); biases stay f32 ----
    bf = jnp.bfloat16
    w1, w2, w3 = params["w1"].astype(bf), params["w2"].astype(bf), params["w3"].astype(bf)
    wd1, wd2, wd3 = params["wd1"].astype(bf), params["wd2"].astype(bf), params["wd3"].astype(bf)
    b1, b2, b3 = params["b1"], params["b2"], params["b3"]
    bd1, bd2, bd3 = params["bd1"], params["bd2"], params["bd3"]

    def batch_spec(width):
        return pl.BlockSpec((TB, width), lambda i: (i, 0))

    def resident_spec(arr):
        shape = arr.shape
        return pl.BlockSpec(shape, lambda i, _s=shape: (0,) * len(_s))

    # Advisory cost model for XLA scheduling around the custom call.
    flops = 2 * B_pad * (obs_dim * hidden + hidden * hidden + hidden * 2 * z_dim
                         + z_dim * hidden + hidden * hidden + hidden * obs_dim)
    weight_bytes = 2 * int(w1.size + w2.size + w3.size + wd1.size + wd2.size + wd3.size)
    bias_bytes = 4 * int(b1.size + b2.size + b3.size + bd1.size + bd2.size + bd3.size)
    io_bytes = 4 * (B_pad * in_w + B_pad * out_w)
    cost = pl.CostEstimate(flops=flops,
                           transcendentals=B_pad * z_dim,
                           bytes_accessed=weight_bytes + bias_bytes + io_bytes)

    fn = pl.pallas_call(
        _make_kernel(obs_dim, z_dim),
        out_shape=jax.ShapeDtypeStruct((B_pad, out_w), jnp.float32),
        grid=(n_tiles,),
        in_specs=[
            batch_spec(in_w),
            resident_spec(w1), resident_spec(b1),
            resident_spec(w2), resident_spec(b2),
            resident_spec(w3), resident_spec(b3),
            resident_spec(wd1), resident_spec(bd1),
            resident_spec(wd2), resident_spec(bd2),
            resident_spec(wd3), resident_spec(bd3),
        ],
        out_specs=batch_spec(out_w),
        compiler_params=pltpu.CompilerParams(
            dimension_semantics=(pltpu.PARALLEL,),
            vmem_limit_bytes=32 * 1024 * 1024),
        cost_estimate=cost,
    )
    packed = fn(io, w1, b1, w2, b2, w3, b3, wd1, bd1, wd2, bd2, wd3, bd3)

    mu = packed[:B, :z_dim]
    std = packed[:B, z_dim:2 * z_dim]
    recon = packed[:B, 2 * z_dim:]
    return mu, std, recon


def init_params(key, obs_dim, z_dim, hidden):
    """Deterministic synthetic init (PyTorch-Linear-style uniform scaling)."""
    def linear(k, fan_in, fan_out):
        kw, kb = jax.random.split(k)
        bound = 1.0 / jnp.sqrt(fan_in)
        w = jax.random.uniform(kw, (fan_in, fan_out), jnp.float32, -bound, bound)
        b = jax.random.uniform(kb, (1, fan_out), jnp.float32, -bound, bound)
        return w, b

    keys = jax.random.split(key, 6)
    p = {}
    # encoder: obs_dim -> hidden -> hidden -> 2*z_dim
    p["w1"], p["b1"] = linear(keys[0], obs_dim, hidden)
    p["w2"], p["b2"] = linear(keys[1], hidden, hidden)
    p["w3"], p["b3"] = linear(keys[2], hidden, 2 * z_dim)
    # decoder: z_dim -> hidden -> hidden -> obs_dim
    p["wd1"], p["bd1"] = linear(keys[3], z_dim, hidden)
    p["wd2"], p["bd2"] = linear(keys[4], hidden, hidden)
    p["wd3"], p["bd3"] = linear(keys[5], hidden, obs_dim)
    return p


def reference_forward(o, eps, p, z_dim):
    h = jnp.maximum(o @ p["w1"] + p["b1"], 0.0)
    h = jnp.maximum(h @ p["w2"] + p["b2"], 0.0)
    enc = h @ p["w3"] + p["b3"]
    mu, logstd = enc[:, :z_dim], enc[:, z_dim:]
    std = jnp.exp(logstd)
    z = mu + std * eps
    d = jnp.maximum(z @ p["wd1"] + p["bd1"], 0.0)
    d = jnp.maximum(d @ p["wd2"] + p["bd2"], 0.0)
    recon = d @ p["wd3"] + p["bd3"]
    return mu, std, recon


if __name__ == "__main__":
    obs_dim, z_dim, hidden = 16, 8, 128
    B = 8

    key = jax.random.PRNGKey(0)
    k_params, k_obs, k_eps = jax.random.split(key, 3)

    params = init_params(k_params, obs_dim, z_dim, hidden)
    o = jax.random.normal(k_obs, (B, obs_dim), jnp.float32)
    # rsample noise (deterministic here so the kernel is reproducible)
    eps = jax.random.normal(k_eps, (B, z_dim), jnp.float32)

    z_mu, z_std, o_recon = base_latent_model_forward(o, eps, params, z_dim=z_dim)
    jax.block_until_ready((z_mu, z_std, o_recon))

    # Correctness check vs. a pure-f32 JAX reference. Tolerances are relaxed
    # deliberately because the kernel uses bf16 MXU operands (f32 accumulation).
    r_mu, r_std, r_recon = reference_forward(o, eps, params, z_dim)
    assert z_mu.shape == (B, z_dim) and z_std.shape == (B, z_dim)
    assert o_recon.shape == (B, obs_dim)
    assert jnp.allclose(z_mu, r_mu, atol=5e-2, rtol=5e-2)
    assert jnp.allclose(z_std, r_std, atol=5e-2, rtol=5e-2)
    assert jnp.allclose(o_recon, r_recon, atol=5e-2, rtol=5e-2)

    print("KERNEL_OK")
</pallas_src>

<mosaic_0001>
module attributes {stable_mosaic.version = 11 : i64} {
  func.func @kernel(%arg0: i32, %arg1: memref<8x24xf32, #tpu.memory_space<vmem>>, %arg2: memref<16x128xbf16, #tpu.memory_space<vmem>>, %arg3: memref<1x128xf32, #tpu.memory_space<vmem>>, %arg4: memref<128x128xbf16, #tpu.memory_space<vmem>>, %arg5: memref<1x128xf32, #tpu.memory_space<vmem>>, %arg6: memref<128x16xbf16, #tpu.memory_space<vmem>>, %arg7: memref<1x16xf32, #tpu.memory_space<vmem>>, %arg8: memref<8x128xbf16, #tpu.memory_space<vmem>>, %arg9: memref<1x128xf32, #tpu.memory_space<vmem>>, %arg10: memref<128x128xbf16, #tpu.memory_space<vmem>>, %arg11: memref<1x128xf32, #tpu.memory_space<vmem>>, %arg12: memref<128x16xbf16, #tpu.memory_space<vmem>>, %arg13: memref<1x16xf32, #tpu.memory_space<vmem>>, %arg14: memref<8x32xf32, #tpu.memory_space<vmem>>) attributes {dimension_semantics = [#tpu.dimension_semantics<parallel>], iteration_bounds = array<i64: 1>, scalar_prefetch = 0 : i64, scratch_operands = 0 : i64, tpu.core_type = #tpu.core_type<tc>, window_params = [{transform_indices = @transform_0, window_bounds = array<i64: 8, 24>}, {pipeline_mode = #tpu.pipeline_mode<synchronous>, transform_indices = @transform_1, window_bounds = array<i64: 16, 128>}, {pipeline_mode = #tpu.pipeline_mode<synchronous>, transform_indices = @transform_2, window_bounds = array<i64: 1, 128>}, {pipeline_mode = #tpu.pipeline_mode<synchronous>, transform_indices = @transform_3, window_bounds = array<i64: 128, 128>}, {pipeline_mode = #tpu.pipeline_mode<synchronous>, transform_indices = @transform_4, window_bounds = array<i64: 1, 128>}, {pipeline_mode = #tpu.pipeline_mode<synchronous>, transform_indices = @transform_5, window_bounds = array<i64: 128, 16>}, {pipeline_mode = #tpu.pipeline_mode<synchronous>, transform_indices = @transform_6, window_bounds = array<i64: 1, 16>}, {pipeline_mode = #tpu.pipeline_mode<synchronous>, transform_indices = @transform_7, window_bounds = array<i64: 8, 128>}, {pipeline_mode = #tpu.pipeline_mode<synchronous>, transform_indices = @transform_8, window_bounds = array<i64: 1, 128>}, {pipeline_mode = #tpu.pipeline_mode<synchronous>, transform_indices = @transform_9, window_bounds = array<i64: 128, 128>}, {pipeline_mode = #tpu.pipeline_mode<synchronous>, transform_indices = @transform_10, window_bounds = array<i64: 1, 128>}, {pipeline_mode = #tpu.pipeline_mode<synchronous>, transform_indices = @transform_11, window_bounds = array<i64: 128, 16>}, {pipeline_mode = #tpu.pipeline_mode<synchronous>, transform_indices = @transform_12, window_bounds = array<i64: 1, 16>}, {transform_indices = @transform_13, window_bounds = array<i64: 8, 32>}]} {
    %c0 = arith.constant 0 : index
    %c0_0 = arith.constant 0 : index
    %0 = vector.load %arg1[%c0, %c0_0] : memref<8x24xf32, #tpu.memory_space<vmem>>, vector<8x24xf32>
    %1 = vector.extract_strided_slice %0 {offsets = [0, 0], sizes = [8, 16], strides = [1, 1]} : vector<8x24xf32> to vector<8x16xf32>
    %2 = arith.truncf %1 : vector<8x16xf32> to vector<8x16xbf16>
    %3 = vector.extract_strided_slice %0 {offsets = [0, 16], sizes = [8, 8], strides = [1, 1]} : vector<8x24xf32> to vector<8x8xf32>
    %c0_1 = arith.constant 0 : index
    %c0_2 = arith.constant 0 : index
    %4 = vector.load %arg2[%c0_1, %c0_2] : memref<16x128xbf16, #tpu.memory_space<vmem>>, vector<16x128xbf16>
    %cst = arith.constant dense<0.000000e+00> : vector<8x128xf32>
    %5 = tpu.matmul %2, %4, %cst {dimension_numbers = #tpu.dot_dimension_numbers<[1], [0], [0], [1], [0, 0, 1, 1], [], []>} : vector<8x16xbf16>, vector<16x128xbf16>, vector<8x128xf32> -> vector<8x128xf32>
    %c0_3 = arith.constant 0 : index
    %c0_4 = arith.constant 0 : index
    %6 = vector.load %arg3[%c0_3, %c0_4] : memref<1x128xf32, #tpu.memory_space<vmem>>, vector<1x128xf32>
    %7 = vector.broadcast %6 : vector<1x128xf32> to vector<8x128xf32>
    %8 = arith.addf %5, %7 : vector<8x128xf32>
    %cst_5 = arith.constant 0.000000e+00 : f32
    %9 = vector.broadcast %cst_5 : f32 to vector<8x128xf32>
    %10 = arith.maximumf %8, %9 : vector<8x128xf32>
    %11 = arith.truncf %10 : vector<8x128xf32> to vector<8x128xbf16>
    %c0_6 = arith.constant 0 : index
    %c0_7 = arith.constant 0 : index
    %12 = vector.load %arg4[%c0_6, %c0_7] : memref<128x128xbf16, #tpu.memory_space<vmem>>, vector<128x128xbf16>
    %cst_8 = arith.constant dense<0.000000e+00> : vector<8x128xf32>
    %13 = tpu.matmul %11, %12, %cst_8 {dimension_numbers = #tpu.dot_dimension_numbers<[1], [0], [0], [1], [0, 0, 1, 1], [], []>} : vector<8x128xbf16>, vector<128x128xbf16>, vector<8x128xf32> -> vector<8x128xf32>
    %c0_9 = arith.constant 0 : index
    %c0_10 = arith.constant 0 : index
    %14 = vector.load %arg5[%c0_9, %c0_10] : memref<1x128xf32, #tpu.memory_space<vmem>>, vector<1x128xf32>
    %15 = vector.broadcast %14 : vector<1x128xf32> to vector<8x128xf32>
    %16 = arith.addf %13, %15 : vector<8x128xf32>
    %cst_11 = arith.constant 0.000000e+00 : f32
    %17 = vector.broadcast %cst_11 : f32 to vector<8x128xf32>
    %18 = arith.maximumf %16, %17 : vector<8x128xf32>
    %19 = arith.truncf %18 : vector<8x128xf32> to vector<8x128xbf16>
    %c0_12 = arith.constant 0 : index
    %c0_13 = arith.constant 0 : index
    %20 = vector.load %arg6[%c0_12, %c0_13] : memref<128x16xbf16, #tpu.memory_space<vmem>>, vector<128x16xbf16>
    %cst_14 = arith.constant dense<0.000000e+00> : vector<8x16xf32>
    %21 = tpu.matmul %19, %20, %cst_14 {dimension_numbers = #tpu.dot_dimension_numbers<[1], [0], [0], [1], [0, 0, 1, 1], [], []>} : vector<8x128xbf16>, vector<128x16xbf16>, vector<8x16xf32> -> vector<8x16xf32>
    %c0_15 = arith.constant 0 : index
    %c0_16 = arith.constant 0 : index
    %22 = vector.load %arg7[%c0_15, %c0_16] : memref<1x16xf32, #tpu.memory_space<vmem>>, vector<1x16xf32>
    %23 = vector.broadcast %22 : vector<1x16xf32> to vector<8x16xf32>
    %24 = arith.addf %21, %23 : vector<8x16xf32>
    %25 = vector.extract_strided_slice %24 {offsets = [0, 0], sizes = [8, 8], strides = [1, 1]} : vector<8x16xf32> to vector<8x8xf32>
    %26 = vector.extract_strided_slice %24 {offsets = [0, 8], sizes = [8, 8], strides = [1, 1]} : vector<8x16xf32> to vector<8x8xf32>
    %27 = math.exp %26 : vector<8x8xf32>
    %28 = arith.mulf %27, %3 : vector<8x8xf32>
    %29 = arith.addf %25, %28 : vector<8x8xf32>
    %30 = arith.truncf %29 : vector<8x8xf32> to vector<8x8xbf16>
    %c0_17 = arith.constant 0 : index
    %c0_18 = arith.constant 0 : index
    %31 = vector.load %arg8[%c0_17, %c0_18] : memref<8x128xbf16, #tpu.memory_space<vmem>>, vector<8x128xbf16>
    %cst_19 = arith.constant dense<0.000000e+00> : vector<8x128xf32>
    %32 = tpu.matmul %30, %31, %cst_19 {dimension_numbers = #tpu.dot_dimension_numbers<[1], [0], [0], [1], [0, 0, 1, 1], [], []>} : vector<8x8xbf16>, vector<8x128xbf16>, vector<8x128xf32> -> vector<8x128xf32>
    %c0_20 = arith.constant 0 : index
    %c0_21 = arith.constant 0 : index
    %33 = vector.load %arg9[%c0_20, %c0_21] : memref<1x128xf32, #tpu.memory_space<vmem>>, vector<1x128xf32>
    %34 = vector.broadcast %33 : vector<1x128xf32> to vector<8x128xf32>
    %35 = arith.addf %32, %34 : vector<8x128xf32>
    %cst_22 = arith.constant 0.000000e+00 : f32
    %36 = vector.broadcast %cst_22 : f32 to vector<8x128xf32>
    %37 = arith.maximumf %35, %36 : vector<8x128xf32>
    %38 = arith.truncf %37 : vector<8x128xf32> to vector<8x128xbf16>
    %c0_23 = arith.constant 0 : index
    %c0_24 = arith.constant 0 : index
    %39 = vector.load %arg10[%c0_23, %c0_24] : memref<128x128xbf16, #tpu.memory_space<vmem>>, vector<128x128xbf16>
    %cst_25 = arith.constant dense<0.000000e+00> : vector<8x128xf32>
    %40 = tpu.matmul %38, %39, %cst_25 {dimension_numbers = #tpu.dot_dimension_numbers<[1], [0], [0], [1], [0, 0, 1, 1], [], []>} : vector<8x128xbf16>, vector<128x128xbf16>, vector<8x128xf32> -> vector<8x128xf32>
    %c0_26 = arith.constant 0 : index
    %c0_27 = arith.constant 0 : index
    %41 = vector.load %arg11[%c0_26, %c0_27] : memref<1x128xf32, #tpu.memory_space<vmem>>, vector<1x128xf32>
    %42 = vector.broadcast %41 : vector<1x128xf32> to vector<8x128xf32>
    %43 = arith.addf %40, %42 : vector<8x128xf32>
    %cst_28 = arith.constant 0.000000e+00 : f32
    %44 = vector.broadcast %cst_28 : f32 to vector<8x128xf32>
    %45 = arith.maximumf %43, %44 : vector<8x128xf32>
    %46 = arith.truncf %45 : vector<8x128xf32> to vector<8x128xbf16>
    %c0_29 = arith.constant 0 : index
    %c0_30 = arith.constant 0 : index
    %47 = vector.load %arg12[%c0_29, %c0_30] : memref<128x16xbf16, #tpu.memory_space<vmem>>, vector<128x16xbf16>
    %cst_31 = arith.constant dense<0.000000e+00> : vector<8x16xf32>
    %48 = tpu.matmul %46, %47, %cst_31 {dimension_numbers = #tpu.dot_dimension_numbers<[1], [0], [0], [1], [0, 0, 1, 1], [], []>} : vector<8x128xbf16>, vector<128x16xbf16>, vector<8x16xf32> -> vector<8x16xf32>
    %c0_32 = arith.constant 0 : index
    %c0_33 = arith.constant 0 : index
    %49 = vector.load %arg13[%c0_32, %c0_33] : memref<1x16xf32, #tpu.memory_space<vmem>>, vector<1x16xf32>
    %50 = vector.broadcast %49 : vector<1x16xf32> to vector<8x16xf32>
    %51 = arith.addf %48, %50 : vector<8x16xf32>
    %c0_34 = arith.constant 0 : index
    %c0_35 = arith.constant 0 : index
    %52 = vector.load %arg14[%c0_34, %c0_35] : memref<8x32xf32, #tpu.memory_space<vmem>>, vector<8x8xf32>
    tpu.vector_store %arg14[%c0_34, %c0_35], %25 {strides = array<i32>} : memref<8x32xf32, #tpu.memory_space<vmem>>, vector<8x8xf32>,
    %c0_36 = arith.constant 0 : index
    %c8 = arith.constant 8 : index
    %53 = vector.load %arg14[%c0_36, %c8] : memref<8x32xf32, #tpu.memory_space<vmem>>, vector<8x8xf32>
    tpu.vector_store %arg14[%c0_36, %c8], %27 {strides = array<i32>} : memref<8x32xf32, #tpu.memory_space<vmem>>, vector<8x8xf32>,
    %c0_37 = arith.constant 0 : index
    %c16 = arith.constant 16 : index
    %54 = vector.load %arg14[%c0_37, %c16] : memref<8x32xf32, #tpu.memory_space<vmem>>, vector<8x16xf32>
    tpu.vector_store %arg14[%c0_37, %c16], %51 {strides = array<i32>} : memref<8x32xf32, #tpu.memory_space<vmem>>, vector<8x16xf32>,
    return
  }
  func.func @transform_0(%arg0: i32) -> (i32, i32) {
    %c0_i32 = arith.constant 0 : i32
    %c0_i32_0 = arith.constant 0 : i32
    return %arg0, %c0_i32 : i32, i32
  }
  func.func @transform_1(%arg0: i32) -> (i32, i32) {
    %c0_i32 = arith.constant 0 : i32
    %c0_i32_0 = arith.constant 0 : i32
    %c0_i32_1 = arith.constant 0 : i32
    return %c0_i32, %c0_i32_0 : i32, i32
  }
  func.func @transform_2(%arg0: i32) -> (i32, i32) {
    %c0_i32 = arith.constant 0 : i32
    %c0_i32_0 = arith.constant 0 : i32
    %c0_i32_1 = arith.constant 0 : i32
    return %c0_i32, %c0_i32_0 : i32, i32
  }
  func.func @transform_3(%arg0: i32) -> (i32, i32) {
    %c0_i32 = arith.constant 0 : i32
    %c0_i32_0 = arith.constant 0 : i32
    %c0_i32_1 = arith.constant 0 : i32
    return %c0_i32, %c0_i32_0 : i32, i32
  }
  func.func @transform_4(%arg0: i32) -> (i32, i32) {
    %c0_i32 = arith.constant 0 : i32
    %c0_i32_0 = arith.constant 0 : i32
    %c0_i32_1 = arith.constant 0 : i32
    return %c0_i32, %c0_i32_0 : i32, i32
  }
  func.func @transform_5(%arg0: i32) -> (i32, i32) {
    %c0_i32 = arith.constant 0 : i32
    %c0_i32_0 = arith.constant 0 : i32
    %c0_i32_1 = arith.constant 0 : i32
    return %c0_i32, %c0_i32_0 : i32, i32
  }
  func.func @transform_6(%arg0: i32) -> (i32, i32) {
    %c0_i32 = arith.constant 0 : i32
    %c0_i32_0 = arith.constant 0 : i32
    %c0_i32_1 = arith.constant 0 : i32
    return %c0_i32, %c0_i32_0 : i32, i32
  }
  func.func @transform_7(%arg0: i32) -> (i32, i32) {
    %c0_i32 = arith.constant 0 : i32
    %c0_i32_0 = arith.constant 0 : i32
    %c0_i32_1 = arith.constant 0 : i32
    return %c0_i32, %c0_i32_0 : i32, i32
  }
  func.func @transform_8(%arg0: i32) -> (i32, i32) {
    %c0_i32 = arith.constant 0 : i32
    %c0_i32_0 = arith.constant 0 : i32
    %c0_i32_1 = arith.constant 0 : i32
    return %c0_i32, %c0_i32_0 : i32, i32
  }
  func.func @transform_9(%arg0: i32) -> (i32, i32) {
    %c0_i32 = arith.constant 0 : i32
    %c0_i32_0 = arith.constant 0 : i32
    %c0_i32_1 = arith.constant 0 : i32
    return %c0_i32, %c0_i32_0 : i32, i32
  }
  func.func @transform_10(%arg0: i32) -> (i32, i32) {
    %c0_i32 = arith.constant 0 : i32
    %c0_i32_0 = arith.constant 0 : i32
    %c0_i32_1 = arith.constant 0 : i32
    return %c0_i32, %c0_i32_0 : i32, i32
  }
  func.func @transform_11(%arg0: i32) -> (i32, i32) {
    %c0_i32 = arith.constant 0 : i32
    %c0_i32_0 = arith.constant 0 : i32
    %c0_i32_1 = arith.constant 0 : i32
    return %c0_i32, %c0_i32_0 : i32, i32
  }
  func.func @transform_12(%arg0: i32) -> (i32, i32) {
    %c0_i32 = arith.constant 0 : i32
    %c0_i32_0 = arith.constant 0 : i32
    %c0_i32_1 = arith.constant 0 : i32
    return %c0_i32, %c0_i32_0 : i32, i32
  }
  func.func @transform_13(%arg0: i32) -> (i32, i32) {
    %c0_i32 = arith.constant 0 : i32
    %c0_i32_0 = arith.constant 0 : i32
    return %arg0, %c0_i32 : i32, i32
  }
}

</mosaic_0001>

<bundles_post_ra>
// kernel: tpu_custom_call.1
= control target key start
LH: loop header
LB: loop body
LE: loop exit
PB: predicated region body
PF: predicated region fallthrough
CT: control target
= control target key end

     0   :  { %18 = vsyncpa [#allocation3], 0  ;;  %s1207_s0 = inlined_call_operand.vmem [shape: f32[8,24], index: 0, kind: input, shape index: {}]   ;;  %s1208_s1 = inlined_call_operand.hbm [shape: bf16[16,128], index: 1, kind: input, shape index: {}]   ;;  %s1209_s2 = inlined_call_operand.vmem [shape: f32[1,128], index: 2, kind: input, shape index: {}]   ;;  %s1210_s3 = inlined_call_operand.vmem [shape: bf16[128,128], index: 3, kind: input, shape index: {}]   ;;  %s1211_s4 = inlined_call_operand.vmem [shape: f32[1,128], index: 4, kind: input, shape index: {}]   ;;  %s1212_s5 = inlined_call_operand.vmem [shape: bf16[128,16], index: 5, kind: input, shape index: {}]   ;;  %s1213_s6 = inlined_call_operand.vmem [shape: f32[1,16], index: 6, kind: input, shape index: {}]   ;;  %s1214_s7 = inlined_call_operand.vmem [shape: bf16[8,128], index: 7, kind: input, shape index: {}]   ;;  %s1215_s8 = inlined_call_operand.vmem [shape: f32[1,128], index: 8, kind: input, shape index: {}]   ;;  %s1216_s9 = inlined_call_operand.vmem [shape: bf16[128,128], index: 9, kind: input, shape index: {}]   ;;  %s1217_s10 = inlined_call_operand.vmem [shape: f32[1,128], index: 10, kind: input, shape index: {}]   ;;  %s1218_s11 = inlined_call_operand.vmem [shape: bf16[128,16], index: 11, kind: input, shape index: {}]   ;;  %s1219_s12 = inlined_call_operand.vmem [shape: f32[1,16], index: 12, kind: input, shape index: {}]   ;;  %s1220_s13 = inlined_call_operand.hbm [shape: f32[8,32], index: 13, kind: output, shape index: {}]  }
   0x1   :  { %19 = vsyncpa [#allocation4], 0  ;;  %s930_s25 = smov [#allocation2]   ;;  %s882_s29 = scalar_lea.hbm %s1208_s1, 128 }
   0x2   :  { %s27_s26 = sshll.u32 %s930_s25, 4  ;;  %p883_p0 = scmp.ne.s32.totalorder %s1208_s1, %s882_s29  ;;  %s28_s26 = int_to_ptr.vmem [resolvable:$true] %s27_s26 }
   0x3   :  { %p886_p1 = scmp.lt.u32.totalorder %s882_s29, %s1208_s1 }
   0x5   :  { %p888_p2 = pnand %p886_p1, %p883_p0 }
   0x7   :  { %891 = shalt.err (!%p888_p2)
}
   0x8   :  { %s892_s17 = scalar_lea.vmem %s28_s26, 128  ;;  %p897_p4 = scmp.lt.s32.totalorder %s28_s26, %s28_s26 }
   0x9   :  { %p893_p3 = scmp.ne.s32.totalorder %s28_s26, %s892_s17  ;;  %p898_p5 = scmp.lt.s32.totalorder %s892_s17, %s892_s17 }
   0xb   :  { %p899_p6 = por %p898_p5, %p897_p4 }
   0xd   :  { %p900_p7 = pnand %p899_p6, %p893_p3 }
   0xf   :  { %903 = shalt.err (!%p900_p7)
}
  0x10   :  { %s931_s18 = smov 64   ;;  %s932_s19 = smov 4  }
  0x11   :  { %33 = dma.hbm_to_vmem [thread:$0]  %s1208_s1, 128, %s28_s26, [#allocation3], %s931_s18, %s931_s18, %s932_s19  }
  0x12   :  { %926 = dma.done.wait [#allocation3], 128  }
  0x13   :  { %927 = vsyncadd [#allocation3], 4294967168  ;;  %v933_v0 = vmov 0.0   ;;  %vm934_vm0 = vmmov 0   ;;  %v847_v1 = vld [vmem:[#allocation2] sm:$0xff]   ;;  %vm77_vm1 = vcmask 130048  }
  0x14   :  { %747 = vmatprep.subr.bf16.mxu0 %v933_v0  ;;  %749 = vmatprep.mubr.msk.bf16.mxu0 %vm934_vm0, %v933_v0  ;;  %v1029_v2 = vld [vmem:[%s1207_s0] sm:$0xff]  ;;  %v849_v5 = vld [vmem:[%s1210_s3 + $0x8] sm:$0xff]   ;;  %v850_v6 = vld [vmem:[%s1210_s3 + $0x10] sm:$0xff]   ;;  %s935_s18 = smov 120   ;;  %vm372_vm2 = vcmask 1043456   ;;  %vm368_vm3 = vcmask 64512  }
  0x15   :  { %753 = vmatprep.subr.bf16.mxu1 %v933_v0  ;;  %769 = vmatprep.mubr.msk.bf16.mxu1 %vm934_vm0, %v933_v0  ;;  %v61_v3 = vpack.c.bf16 %v1029_v2, %v1029_v2  ;;  %v848_v4 = vld [vmem:[%s1210_s3] sm:$0xff]   ;;  %v851_v7 = vld [vmem:[%s1210_s3 + $0x18] sm:$0xff]   ;;  %v853_v9 = vld [vmem:[%s1210_s3 + $0x28] sm:$0xff]   ;;  %vm643_vm4 = vcmask 130112   ;;  %vm649_vm5 = vcmask 261248  }
  0x16   :  { %748 = vmatpush3.bf16.msra.mxu0 %v847_v1  ;;  %754 = vmatpush3.bf16.msra.mxu1 %v848_v4  ;;  %v852_v8 = vld [vmem:[%s1210_s3 + $0x20] sm:$0xff]   ;;  %v854_v10 = vld [vmem:[%s1210_s3 + $0x30] sm:$0xff]   ;;  %v855_v11 = vld [vmem:[%s1210_s3 + $0x38] sm:$0xff]  }
  0x17   :  { %773 = vmatprep.subr.bf16.mxu0 %v933_v0  ;;  %755 = vmatprep.subr.bf16.mxu1 %v933_v0  ;;  %v856_v12 = vld [vmem:[%s1212_s5] sm:$0xff]   ;;  %v857_v13 = vld [vmem:[%s1212_s5 + $0x8] sm:$0xff]   ;;  %v858_v14 = vld [vmem:[%s1212_s5 + $0x10] sm:$0xff]  }
  0x18   :  { %v859_v15 = vld [vmem:[%s1212_s5 + $0x18] sm:$0xff]   ;;  %v860_v16 = vld [vmem:[%s1212_s5 + $0x20] sm:$0xff]   ;;  %v861_v17 = vld [vmem:[%s1212_s5 + $0x28] sm:$0xff]   ;;  %350 = vrot.lane.b32.xlu0 %v1029_v2, %s935_s18 }
  0x19   :  { %750 = vmatmul.mubr.msk.bf16.vlgmr.msra.gmra.mrb[0].mxu0 %vm77_vm1, %v61_v3  ;;  %v666_v18 = vld [vmem:[%s1209_s2] ss:$0 sm:$0xff]  ;;  %v862_v26 = vld [vmem:[%s1212_s5 + $0x30] sm:$0xff]   ;;  %v863_v27 = vld [vmem:[%s1212_s5 + $0x38] sm:$0xff]  }
  0x1a   :  { %789 = vmatprep.mubr.msk.bf16.mxu0 %vm934_vm0, %v933_v0  ;;  %756 = vmatpush3.bf16.msra.mxu1 %v849_v5  ;;  %v669_v28 = vld [vmem:[%s1211_s4] ss:$0 sm:$0xff]  ;;  %v865_v46 = vld [vmem:[%s1216_s9 + $0x8] sm:$0xff]   ;;  %v866_v49 = vld [vmem:[%s1216_s9 + $0x10] sm:$0xff]  }
  0x1b   :  { %757 = vmatprep.subr.bf16.mxu1 %v933_v0  ;;  %774 = vmatpush3.bf16.msra.mxu0 %v856_v12  ;;  %v360_v36 = vld [vmem:[%s1214_s7] sm:$0xf]  ;;  %v867_v51 = vld [vmem:[%s1216_s9 + $0x18] sm:$0xff]   ;;  %v869_v53 = vld [vmem:[%s1216_s9 + $0x28] sm:$0xff]  }
  0x1c   :  { %775 = vmatprep.subr.bf16.mxu0 %v933_v0  ;;  %v374_v37 = vsel %vm372_vm2, %v360_v36, 0  ;;  %v678_v38 = vld [vmem:[%s1213_s6] ss:$0 sm:$0xff]  ;;  %v870_v57 = vld [vmem:[%s1216_s9 + $0x30] sm:$0xff]   ;;  %v871_v58 = vld [vmem:[%s1216_s9 + $0x38] sm:$0xff]  }
  0x1d   :  { %v864_v45 = vld [vmem:[%s1216_s9] sm:$0xff]   ;;  %v873_v60 = vld [vmem:[%s1218_s11 + $0x8] sm:$0xff]   ;;  %v874_v61 = vld [vmem:[%s1218_s11 + $0x10] sm:$0xff]  }
  0x1e   :  { %758 = vmatpush3.bf16.msra.mxu1 %v850_v6  ;;  %v868_v52 = vld [vmem:[%s1216_s9 + $0x20] sm:$0xff]   ;;  %v875_v62 = vld [vmem:[%s1218_s11 + $0x18] sm:$0xff]   ;;  %v877_v1 = vld [vmem:[%s1218_s11 + $0x28] sm:$0xff]  }
  0x1f   :  { %759 = vmatprep.subr.bf16.mxu1 %v933_v0  ;;  %776 = vmatpush3.bf16.msra.mxu0 %v857_v13  ;;  %v872_v59 = vld [vmem:[%s1218_s11] sm:$0xff]  }
  0x20   :  { %777 = vmatprep.subr.bf16.mxu0 %v933_v0  ;;  %v876_v63 = vld [vmem:[%s1218_s11 + $0x20] sm:$0xff]  }
  0x21   :  { %v687_v2 = vld [vmem:[%s1215_s8] ss:$0 sm:$0xff] }
  0x22   :  { %760 = vmatpush3.bf16.msra.mxu1 %v851_v7  ;;  %v689_v12 = vld [vmem:[%s1217_s10] ss:$0 sm:$0xff]  ;;  %s937_s10 = smov [#allocation5]  }
  0x23   :  { %761 = vmatprep.subr.bf16.mxu1 %v933_v0  ;;  %778 = vmatpush3.bf16.msra.mxu0 %v858_v14  ;;  %s657_s29 = sshll.u32 %s937_s10, 4  ;;  %s658_s29 = int_to_ptr.vmem [resolvable:$true] %s657_s29 }
  0x24   :  { %779 = vmatprep.subr.bf16.mxu0 %v933_v0  ;;  %s904_s30 = scalar_lea.vmem %s658_s29, 128  ;;  %p909_p9 = scmp.lt.s32.totalorder %s658_s29, %s658_s29 }
  0x25   :  { %p905_p8 = scmp.ne.s32.totalorder %s658_s29, %s904_s30  ;;  %p910_p10 = scmp.lt.s32.totalorder %s904_s30, %s904_s30 }
  0x26   :  { %762 = vmatpush3.bf16.msra.mxu1 %v852_v8 }
  0x27   :  { %763 = vmatprep.subr.bf16.mxu1 %v933_v0  ;;  %780 = vmatpush3.bf16.msra.mxu0 %v859_v15  ;;  %p911_p11 = por %p910_p10, %p909_p9 }
  0x28   :  { %781 = vmatprep.subr.bf16.mxu0 %v933_v0 }
  0x29   :  { %p912_p12 = pnand %p911_p11, %p905_p8 }
  0x2a   :  { %764 = vmatpush3.bf16.msra.mxu1 %v853_v9 }
  0x2b   :  { %765 = vmatprep.subr.bf16.mxu1 %v933_v0  ;;  %782 = vmatpush3.bf16.msra.mxu0 %v860_v16 }
  0x2c   :  { %783 = vmatprep.subr.bf16.mxu0 %v933_v0 }
  0x2e   :  { %766 = vmatpush3.bf16.msra.mxu1 %v854_v10  ;;  %v878_v10 = vld [vmem:[%s1218_s11 + $0x30] sm:$0xff]  }
  0x2f   :  { %767 = vmatprep.subr.bf16.mxu1 %v933_v0  ;;  %784 = vmatpush3.bf16.msra.mxu0 %v861_v17 }
  0x30   :  { %785 = vmatprep.subr.bf16.mxu0 %v933_v0 }
  0x32   :  { %768 = vmatpush3.bf16.msra.mxu1 %v855_v11  ;;  %v879_v11 = vld [vmem:[%s1218_s11 + $0x38] sm:$0xff]   ;;  %s936_s11 = smov 16  }
  0x33   :  { %793 = vmatprep.subr.bf16.mxu1 %v933_v0  ;;  %786 = vmatpush3.bf16.msra.mxu0 %v862_v26 }
  0x34   :  { %787 = vmatprep.subr.bf16.mxu0 %v933_v0 }
  0x37   :  { %788 = vmatpush3.bf16.msra.mxu0 %v863_v27 }
  0x38   :  { %799 = vmatprep.subr.bf16.mxu0 %v933_v0 }
  0x8a   :  { %v351_v47 = vpop.permute.xlu0 %350 }
  0xec   :  { %v115_v19 = vpop.f32.mrb[0].mxu0 }
  0xed   :  { %v116_v20 = vadd.f32 %v666_v18, %v115_v19  ;;  %v751_v21 = vpop.f32.mrb[1].mxu0 }
  0xee   :  { %v118_v22 = vpop.f32.mrb[2].mxu0 }
  0xef   :  { %v121_v23 = vmax.f32 %v116_v20, 0.0  ;;  %v752_v24 = vpop.f32.mrb[3].mxu0 }
  0xf1   :  { %v122_v25 = vpack.c.bf16 %v121_v23, %v121_v23 }
  0xf3   :  { %770 = vmatmul.mubr.bf16.vlgmr.msra.gmra.mrb[0].mxu1 %v122_v25 }
  0xf4   :  { %795 = vmatprep.mubr.msk.bf16.mxu1 %vm934_vm0, %v933_v0  ;;  %794 = vmatpush3.bf16.msra.mxu1 %v374_v37 }
  0xf5   :  { %819 = vmatprep.subr.bf16.mxu1 %v933_v0 }
 0x1c6   :  { %v228_v29 = vpop.f32.mrb[0].mxu1 }
 0x1c7   :  { %v229_v30 = vadd.f32 %v669_v28, %v228_v29  ;;  %v771_v31 = vpop.f32.mrb[1].mxu1 }
 0x1c8   :  { %v231_v32 = vpop.f32.mrb[2].mxu1 }
 0x1c9   :  { %v234_v33 = vmax.f32 %v229_v30, 0.0  ;;  %v772_v34 = vpop.f32.mrb[3].mxu1 }
 0x1cb   :  { %v235_v35 = vpack.c.bf16 %v234_v33, %v234_v33 }
 0x1cd   :  { %790 = vmatmul.mubr.bf16.vlgmr.msra.gmra.mrb[4].mxu0 %v235_v35 }
 0x1ce   :  { %815 = vmatprep.mubr.msk.bf16.mxu0 %vm934_vm0, %v933_v0  ;;  %800 = vmatpush3.bf16.msra.mxu0 %v864_v45 }
 0x1cf   :  { %801 = vmatprep.subr.bf16.mxu0 %v933_v0 }
 0x1d2   :  { %802 = vmatpush3.bf16.msra.mxu0 %v865_v46 }
 0x1d3   :  { %803 = vmatprep.subr.bf16.mxu0 %v933_v0 }
 0x1d6   :  { %804 = vmatpush3.bf16.msra.mxu0 %v866_v49 }
 0x1d7   :  { %805 = vmatprep.subr.bf16.mxu0 %v933_v0 }
 0x1da   :  { %806 = vmatpush3.bf16.msra.mxu0 %v867_v51 }
 0x1db   :  { %807 = vmatprep.subr.bf16.mxu0 %v933_v0 }
 0x1de   :  { %808 = vmatpush3.bf16.msra.mxu0 %v868_v52 }
 0x1df   :  { %809 = vmatprep.subr.bf16.mxu0 %v933_v0 }
 0x1e2   :  { %810 = vmatpush3.bf16.msra.mxu0 %v869_v53 }
 0x1e3   :  { %811 = vmatprep.subr.bf16.mxu0 %v933_v0 }
 0x1e6   :  { %812 = vmatpush3.bf16.msra.mxu0 %v870_v57 }
 0x1e7   :  { %813 = vmatprep.subr.bf16.mxu0 %v933_v0 }
 0x1ea   :  { %814 = vmatpush3.bf16.msra.mxu0 %v871_v58 }
 0x2a0   :  { %v341_v39 = vpop.f32.mrb[4].mxu0 }
 0x2a1   :  { %v342_v40 = vadd.f32 %v678_v38, %v341_v39  ;;  %v791_v41 = vpop.f32.mrb[5].mxu0 }
 0x2a2   :  { %v344_v42 = vpop.f32.mrb[6].mxu0 }
 0x2a3   :  { %v347_v43 = vmul.f32 1.442695, %v342_v40  ;;  %642 = vst.msk [vmem:[#allocation5] sm:$0xff] %vm368_vm3, %v342_v40  ;;  %v792_v44 = vpop.f32.mrb[7].mxu0 }
 0x2a5   :  { %880 = vpow2.f32 %v347_v43 }
 0x2af   :  { %v881_v48 = vpop.eup %880 }
 0x2b0   :  { %v353_v50 = vmul.f32 %v881_v48, %v351_v47  ;;  %644 = vst.msk [vmem:[#allocation5] sm:$0xff] %vm643_vm4, %v881_v48 }
 0x2b2   :  { %355 = vrot.lane.b32.xlu0 %v353_v50, %s935_s18 }
 0x324   :  { %v356_v54 = vpop.permute.xlu0 %355 }
 0x325   :  { %v358_v55 = vadd.f32 %v356_v54, %v342_v40 }
 0x327   :  { %v359_v56 = vpack.c.bf16 %v358_v55, %v358_v55 }
 0x329   :  { %796 = vmatmul.mubr.msk.bf16.vlgmr.msra.gmra.mrb[4].mxu1 %vm368_vm3, %v359_v56 }
 0x32a   :  { %835 = vmatprep.mubr.msk.bf16.mxu1 %vm934_vm0, %v933_v0  ;;  %820 = vmatpush3.bf16.msra.mxu1 %v872_v59 }
 0x32b   :  { %821 = vmatprep.subr.bf16.mxu1 %v933_v0 }
 0x32e   :  { %822 = vmatpush3.bf16.msra.mxu1 %v873_v60 }
 0x32f   :  { %823 = vmatprep.subr.bf16.mxu1 %v933_v0 }
 0x332   :  { %824 = vmatpush3.bf16.msra.mxu1 %v874_v61 }
 0x333   :  { %825 = vmatprep.subr.bf16.mxu1 %v933_v0 }
 0x336   :  { %826 = vmatpush3.bf16.msra.mxu1 %v875_v62 }
 0x337   :  { %827 = vmatprep.subr.bf16.mxu1 %v933_v0 }
 0x33a   :  { %828 = vmatpush3.bf16.msra.mxu1 %v876_v63 }
 0x33b   :  { %829 = vmatprep.subr.bf16.mxu1 %v933_v0 }
 0x33e   :  { %830 = vmatpush3.bf16.msra.mxu1 %v877_v1 }
 0x33f   :  { %831 = vmatprep.subr.bf16.mxu1 %v933_v0 }
 0x342   :  { %832 = vmatpush3.bf16.msra.mxu1 %v878_v10 }
 0x343   :  { %833 = vmatprep.subr.bf16.mxu1 %v933_v0  ;;  %v698_v0 = vld [vmem:[%s1219_s12] ss:$0 sm:$0xff] }
 0x346   :  { %834 = vmatpush3.bf16.msra.mxu1 %v879_v11 }
 0x3fc   :  { %v410_v3 = vpop.f32.mrb[4].mxu1 }
 0x3fd   :  { %v411_v4 = vadd.f32 %v687_v2, %v410_v3  ;;  %v797_v5 = vpop.f32.mrb[5].mxu1 }
 0x3fe   :  { %v413_v6 = vpop.f32.mrb[6].mxu1 }
 0x3ff   :  { %v416_v7 = vmax.f32 %v411_v4, 0.0  ;;  %v798_v8 = vpop.f32.mrb[7].mxu1 }
 0x401   :  { %v417_v9 = vpack.c.bf16 %v416_v7, %v416_v7 }
 0x403   :  { %816 = vmatmul.mubr.bf16.vlgmr.msra.gmra.mrb[8].mxu0 %v417_v9 }
 0x4d6   :  { %v523_v13 = vpop.f32.mrb[8].mxu0 }
 0x4d7   :  { %v524_v14 = vadd.f32 %v689_v12, %v523_v13  ;;  %v817_v15 = vpop.f32.mrb[9].mxu0 }
 0x4d8   :  { %v526_v16 = vpop.f32.mrb[10].mxu0 }
 0x4d9   :  { %v529_v17 = vmax.f32 %v524_v14, 0.0  ;;  %v818_v18 = vpop.f32.mrb[11].mxu0 }
 0x4db   :  { %v530_v19 = vpack.c.bf16 %v529_v17, %v529_v17 }
 0x4dd   :  { %836 = vmatmul.mubr.bf16.vlgmr.msra.gmra.mrb[8].mxu1 %v530_v19 }
 0x5b0   :  { %v636_v20 = vpop.f32.mrb[8].mxu1 }
 0x5b1   :  { %v637_v21 = vadd.f32 %v698_v0, %v636_v20  ;;  %v837_v22 = vpop.f32.mrb[9].mxu1 }
 0x5b2   :  { %v639_v23 = vpop.f32.mrb[10].mxu1 }
 0x5b3   :  { %646 = vrot.lane.b32.xlu1 %v637_v21, %s936_s11  ;;  %v838_v24 = vpop.f32.mrb[11].mxu1 }
 0x625   :  { %v647_v25 = vpop.permute.xlu1 %646 }
 0x626   :  { %650 = vst.msk [vmem:[#allocation5] sm:$0xff] %vm649_vm5, %v647_v25 }
 0x627   :  { %915 = shalt.err (!%p912_p12)
}
 0x628   :  { %s916_s15 = scalar_lea.hbm %s1220_s13, 128 }
 0x629   :  { %p917_p13 = scmp.ne.s32.totalorder %s1220_s13, %s916_s15  ;;  %p920_p0 = scmp.lt.u32.totalorder %s916_s15, %s1220_s13 }
 0x62b   :  { %p922_p1 = pnand %p920_p0, %p917_p13 }
 0x62d   :  { %925 = shalt.err (!%p922_p1)
}
 0x62e   :  { %660 = dma.vmem_to_hbm [thread:$0]  %s658_s29, 128, %s1220_s13, [#allocation4]  }
 0x62f   :  { %928 = dma.done.wait [#allocation4], 128  }
 0x630   :  { %929 = vsyncadd [#allocation4], 4294967168 }
 0x631   :  { %664 = vsyncpa [#allocation3], 1 }
 0x632   :  { %665 = vsyncpa [#allocation4], 1 }

</bundles_post_ra>
